<compile_context>
chip_gen: v6e
topology: v6e:2x2x1
jax: 0.10.0
libtpu: 0.0.40
codegen_flags: <defaults>
</compile_context>

<pallas_src>
import jax
import jax.numpy as jnp
from jax.experimental import pallas as pl
from jax.experimental.pallas import tpu as pltpu


def _upsample_kernel(a_ref, bT_ref, bias_ref, o_ref):
    # a_ref:    (Cin, T)    activation tile, flattened spatial in the lane axis
    # bT_ref:   (Nout, Cin) reshaped weight, resident across the whole grid
    # bias_ref: (Nout, 1)   f32 bias repeated over the f*f kernel positions
    # o_ref:    (Nout, T)   output tile, flattened spatial in the lane axis
    acc = jnp.dot(bT_ref[...], a_ref[...], preferred_element_type=jnp.float32)
    o_ref[...] = (acc + bias_ref[...]).astype(o_ref.dtype)


def _choose_spatial_tile(S, tm_target):
    """Pick a lane tile for the flattened-spatial axis.

    Preference order:
      1. single full-extent block (always layout legal, no pad),
      2. a multiple of 128 that divides S exactly (no pad pass),
      3. pad S up to a multiple of a 128-aligned tile (rare fallback).
    Returns (tile, padded_S).
    """
    tm_target = max(128, (tm_target // 128) * 128)
    if S <= tm_target:
        return S, S
    t = tm_target
    while t >= 128:
        if S % t == 0:
            return t, S
        t -= 128
    s_pad = ((S + tm_target - 1) // tm_target) * tm_target
    return tm_target, s_pad


def upsample_convtranspose3d(x, weight, bias, downsample_factor, *, tm=2048):
    """x: (N, C_in, D, H, W)  weight: (C_in, C_out, 1, f, f)  bias: (C_out,)"""
    f = int(downsample_factor)
    N, Cin, D, H, W = x.shape
    Cin_w, Cout, kD, kH, kW = weight.shape
    assert (Cin_w, kD, kH, kW) == (Cin, 1, f, f), "weight shape mismatch"

    S = D * H * W
    Nout = Cout * f * f

    # Keep the double-buffered (input + output) tile well under scoped VMEM.
    vmem_budget = 24 * 1024 * 1024
    bytes_per_lane = 2 * (Cin + Nout) * 4          # two pipeline buffers, f32
    tm_cap = max(128, (vmem_budget // bytes_per_lane) // 128 * 128)
    tile, s_pad = _choose_spatial_tile(S, min(tm, tm_cap))

    # ---- input: pure view of NCDHW (no transpose / extra HBM pass) ----
    a = x.reshape(N, Cin, S)
    if s_pad != S:
        # Rare fallback: S has no 128-aligned divisor <= tile. One small pad pass.
        a = jnp.pad(a, ((0, 0), (0, 0), (0, s_pad - S)))

    # ---- weight: (Cin, Cout, 1, f, f) -> (Nout, Cin), q = co*f*f + i*f + j ----
    b_t = jnp.transpose(weight[:, :, 0], (1, 2, 3, 0)).reshape(Nout, Cin)
    bias_col = jnp.repeat(bias.astype(jnp.float32), f * f).reshape(Nout, 1)

    grid = (N, s_pad // tile)
    cost = pl.CostEstimate(
        flops=2 * N * Nout * Cin * s_pad,
        transcendentals=0,
        bytes_accessed=4 * (N * Cin * s_pad + N * Nout * s_pad + Nout * Cin + Nout),
    )

    out_t = pl.pallas_call(
        _upsample_kernel,
        out_shape=jax.ShapeDtypeStruct((N, Nout, s_pad), x.dtype),
        grid_spec=pltpu.PrefetchScalarGridSpec(
            num_scalar_prefetch=0,
            grid=grid,
            in_specs=[
                # (None, ...) squeezes the batch dim out of the kernel ref.
                pl.BlockSpec((None, Cin, tile), lambda n, s: (n, 0, s)),
                pl.BlockSpec((Nout, Cin), lambda n, s: (0, 0)),
                pl.BlockSpec((Nout, 1), lambda n, s: (0, 0)),
            ],
            out_specs=pl.BlockSpec((None, Nout, tile), lambda n, s: (n, 0, s)),
        ),
        compiler_params=pltpu.CompilerParams(
            dimension_semantics=("parallel", "parallel"),
            # Raises v5e's 16 MiB scoped default; safe on v6e/v7x as well.
            vmem_limit_bytes=32 * 1024 * 1024,
        ),
        cost_estimate=cost,
    )(a, b_t, bias_col)

    if s_pad != S:
        out_t = out_t[:, :, :S]

    # ---- pixel-shuffle back to NCDHW upsampled layout (plain XLA layout glue) ----
    out = out_t.reshape(N, Cout, f, f, D, H, W)       # (n, co, i, j, d, h, w)
    out = jnp.transpose(out, (0, 1, 4, 5, 2, 6, 3))   # (n, co, d, h, i, w, j)
    out = out.reshape(N, Cout, D, H * f, W * f)
    return out


def _reference(x, weight, bias, f):
    # out[n,co,d,h*f+i,w*f+j] = sum_ci x[n,ci,d,h,w] * W[ci,co,0,i,j] + b[co]
    o = jnp.einsum("ncdhw,coij->nodhiwj", x, weight[:, :, 0])
    N, Cout, D, H, f1, W, f2 = o.shape
    o = o.reshape(N, Cout, D, H * f1, W * f2)
    return o + bias[None, :, None, None, None]


if __name__ == "__main__":
    key = jax.random.PRNGKey(0)
    kx, kw, kb = jax.random.split(key, 3)

    # small shapes consistent with the module (NCDHW input)
    N, Cin, Cout, D, H, W = 2, 4, 8, 3, 8, 8
    f = 2  # downsample_factor

    x = jax.random.normal(kx, (N, Cin, D, H, W), dtype=jnp.float32)
    # deterministic synthetic parameters (shapes match nn.ConvTranspose3d)
    fan = Cin * 1 * f * f
    bound = 1.0 / (fan ** 0.5)
    weight = jax.random.uniform(kw, (Cin, Cout, 1, f, f), jnp.float32, -bound, bound)
    bias = jax.random.uniform(kb, (Cout,), jnp.float32, -bound, bound)

    # Case 1: small spatial extent (S=192) -> single full-extent lane block.
    out = jax.block_until_ready(upsample_convtranspose3d(x, weight, bias, f))
    ref = _reference(x, weight, bias, f)
    assert out.shape == (N, Cout, D, H * f, W * f), out.shape
    assert jnp.allclose(out, ref, atol=1e-5, rtol=1e-5), "mismatch vs reference (case 1)"

    # Case 2: tiled path using a 128-aligned divisor of S (S=1280, tm=512 -> tile=256, no pad).
    x2 = jax.random.normal(jax.random.PRNGKey(1), (2, Cin, 5, 16, 16), jnp.float32)
    out2 = jax.block_until_ready(upsample_convtranspose3d(x2, weight, bias, f, tm=512))
    ref2 = _reference(x2, weight, bias, f)
    assert out2.shape == (2, Cout, 5, 32, 32), out2.shape
    assert jnp.allclose(out2, ref2, atol=1e-5, rtol=1e-5), "mismatch vs reference (case 2)"

    # Case 3: ragged S with no 128-aligned divisor (S=1000) -> padded fallback path.
    x3 = jax.random.normal(jax.random.PRNGKey(2), (2, Cin, 5, 10, 20), jnp.float32)
    out3 = jax.block_until_ready(upsample_convtranspose3d(x3, weight, bias, f, tm=512))
    ref3 = _reference(x3, weight, bias, f)
    assert out3.shape == (2, Cout, 5, 20, 40), out3.shape
    assert jnp.allclose(out3, ref3, atol=1e-5, rtol=1e-5), "mismatch vs reference (case 3)"

    print("KERNEL_OK")
</pallas_src>

<mosaic_0001>
module attributes {stable_mosaic.version = 11 : i64} {
  func.func @_upsample_kernel(%arg0: i32, %arg1: i32, %arg2: memref<1x4x192xf32, #tpu.memory_space<vmem>>, %arg3: memref<32x4xf32, #tpu.memory_space<vmem>>, %arg4: memref<32x1xf32, #tpu.memory_space<vmem>>, %arg5: memref<1x32x192xf32, #tpu.memory_space<vmem>>) attributes {dimension_semantics = [#tpu.dimension_semantics<parallel>, #tpu.dimension_semantics<parallel>], iteration_bounds = array<i64: 2, 1>, scalar_prefetch = 0 : i64, scratch_operands = 0 : i64, tpu.core_type = #tpu.core_type<tc>, window_params = [{transform_indices = @transform_0, window_bounds = array<i64: 1, 4, 192>}, {pipeline_mode = #tpu.pipeline_mode<synchronous>, transform_indices = @transform_1, window_bounds = array<i64: 32, 4>}, {pipeline_mode = #tpu.pipeline_mode<synchronous>, transform_indices = @transform_2, window_bounds = array<i64: 32, 1>}, {transform_indices = @transform_3, window_bounds = array<i64: 1, 32, 192>}]} {
    %c0 = arith.constant 0 : index
    %c0_0 = arith.constant 0 : index
    %0 = vector.load %arg3[%c0, %c0_0] : memref<32x4xf32, #tpu.memory_space<vmem>>, vector<32x4xf32>
    %c0_1 = arith.constant 0 : index
    %c0_2 = arith.constant 0 : index
    %c0_3 = arith.constant 0 : index
    %1 = vector.load %arg2[%c0_1, %c0_2, %c0_3] : memref<1x4x192xf32, #tpu.memory_space<vmem>>, vector<1x4x192xf32>
    %2 = vector.shape_cast %1 : vector<1x4x192xf32> to vector<4x192xf32>
    %cst = arith.constant dense<0.000000e+00> : vector<32x192xf32>
    %3 = tpu.matmul %0, %2, %cst {dimension_numbers = #tpu.dot_dimension_numbers<[1], [0], [0], [1], [0, 0, 1, 1], [], []>} : vector<32x4xf32>, vector<4x192xf32>, vector<32x192xf32> -> vector<32x192xf32>
    %c0_4 = arith.constant 0 : index
    %c0_5 = arith.constant 0 : index
    %4 = vector.load %arg4[%c0_4, %c0_5] : memref<32x1xf32, #tpu.memory_space<vmem>>, vector<32x1xf32>
    %5 = vector.broadcast %4 : vector<32x1xf32> to vector<32x192xf32>
    %6 = arith.addf %3, %5 : vector<32x192xf32>
    %c0_6 = arith.constant 0 : index
    %c0_7 = arith.constant 0 : index
    %c0_8 = arith.constant 0 : index
    %7 = vector.load %arg5[%c0_6, %c0_7, %c0_8] : memref<1x32x192xf32, #tpu.memory_space<vmem>>, vector<1x32x192xf32>
    %8 = vector.shape_cast %7 : vector<1x32x192xf32> to vector<32x192xf32>
    %9 = vector.shape_cast %6 : vector<32x192xf32> to vector<1x32x192xf32>
    tpu.vector_store %arg5[%c0_6, %c0_7, %c0_8], %9 {strides = array<i32>} : memref<1x32x192xf32, #tpu.memory_space<vmem>>, vector<1x32x192xf32>,
    return
  }
  func.func @transform_0(%arg0: i32, %arg1: i32) -> (i32, i32, i32) {
    %c0_i32 = arith.constant 0 : i32
    %c0_i32_0 = arith.constant 0 : i32
    return %arg0, %c0_i32, %arg1 : i32, i32, i32
  }
  func.func @transform_1(%arg0: i32, %arg1: i32) -> (i32, i32) {
    %c0_i32 = arith.constant 0 : i32
    %c0_i32_0 = arith.constant 0 : i32
    %c0_i32_1 = arith.constant 0 : i32
    return %c0_i32, %c0_i32_0 : i32, i32
  }
  func.func @transform_2(%arg0: i32, %arg1: i32) -> (i32, i32) {
    %c0_i32 = arith.constant 0 : i32
    %c0_i32_0 = arith.constant 0 : i32
    %c0_i32_1 = arith.constant 0 : i32
    return %c0_i32, %c0_i32_0 : i32, i32
  }
  func.func @transform_3(%arg0: i32, %arg1: i32) -> (i32, i32, i32) {
    %c0_i32 = arith.constant 0 : i32
    %c0_i32_0 = arith.constant 0 : i32
    return %arg0, %c0_i32, %arg1 : i32, i32, i32
  }
}

</mosaic_0001>

<bundles_post_ra>
// kernel: tpu_custom_call.1
= control target key start
LH: loop header
LB: loop body
LE: loop exit
PB: predicated region body
PF: predicated region fallthrough
CT: control target
= control target key end

     0   :  { %8 = vsyncpa [#allocation3], 0  ;;  %s776_s0 = inlined_call_operand.vmem [shape: f32[2,4,192], index: 0, kind: input, shape index: {}]   ;;  %s777_s1 = inlined_call_operand.vmem [shape: f32[32,4], index: 1, kind: input, shape index: {}]   ;;  %s778_s2 = inlined_call_operand.vmem [shape: f32[32,1], index: 2, kind: input, shape index: {}]   ;;  %s779_s3 = inlined_call_operand.hbm [shape: f32[2,32,192], index: 3, kind: output, shape index: {}]  }
   0x1   :  { %10 = vsyncpa [#allocation3 + $0x1], 0  ;;  %s630_s12 = smov 0   ;;  %s632_s13 = smov 0  }
   0x2   :  { %s634_s14 = smov 0   ;;  %s636_s15 = smov 0  }
   0x3   :  { %s638_s16 = smov 0   ;;  %s640_s17 = smov 0  }
   0x4 LB: > { %s442_s18 = sadd.s32 4294967295, %s603_s17   ;;  %s443_s19 = sadd.s32 4294967294, %s603_s17   ;;  %s603_s17 = sphi %s640_s17, %s16_s17   ;;  %s599_s16 = sphi %s638_s16, %s786_s16   ;;  %s595_s15 = sphi %s636_s15, %s785_s15   ;;  %s591_s14 = sphi %s634_s14, %s784_s14   ;;  %s587_s13 = sphi %s632_s13, %s783_s13   ;;  %s583_s12 = sphi %s630_s12, %s782_s12  }
   0x5   : > { %s28_s20 = sadd.s32 1, %s599_s16  ;;  %s107_s21 = sadd.s32 1, %s591_s14 }
   0x6   : > { %p30_p0 = scmp.ge.s32.totalorder %s28_s20, 2  ;;  %p117_p1 = scmp.ne.s32.totalorder %s591_s14, %s587_s13 }
   0x7   : > { %p118_p2 = scmp.eq.s32.totalorder %s442_s18, 1  ;;  %p123_p3 = scmp.ne.s32.totalorder %s587_s13, %s583_s12 }
   0x8   : > { %s788_s20 = smov (%p30_p0, %s28_s20), 0  ;;  %p124_p5 = scmp.eq.s32.totalorder %s443_s19, 1 }
   0x9   : > { %p670_p4 = por %p118_p2, %p117_p1  ;;  %s102_s23 = ssub.s32 %s599_s16, %s788_s20 }
   0xa   : > { %p446_p6 = scmp.ge.s32.totalorder %s603_s17, 1  ;;  %p105_p7 = scmp.eq.s32.totalorder %s102_s23, 0 }
   0xb   : > { %p677_p8 = por %p124_p5, %p123_p3  ;;  %p161_p9 = scmp.lt.s32.totalorder %s603_s17, 3 }
   0xc   : > { %s683_s25 = scalar_select %p105_p7, %s591_s14, %s107_s21  }
   0xd   : > { %p162_p10 = pnand %p446_p6, %p161_p9 }
   0xe   : > { %p190_p11 = scmp.lt.s32.totalorder (!%p162_p10), %s595_s15, 1  ;;  %s186_s30 = sand.u32 (!%p162_p10), 1, %s587_s13  }
   0xf   : > { %165 = sbr.rel (%p162_p10) target bundleno = 245 (0xf5), region = 32  ;;  %s462_s6 = sshll.u32 (!%p162_p10), %s595_s15, 10 }
  0x10   : > { %s723_s10 = scalar_lea.hbm (!%p162_p10), %s779_s3, %s462_s6  ;;  %s607_s18 = smov (!%p162_p10), [#allocation2]  }
  0x11   : > { %s531_s19 = sshll.u32 (!%p162_p10), %s607_s18, 4  ;;  %s532_s19 = int_to_ptr.vmem [resolvable:$false] %s531_s19 }
  0x12   : > { %s533_s21 = scalar_lea.vmem (!%p162_p10), %s532_s19, 2048 }
  0x14   : > { %v605_v0 = vmov 0.0   ;;  %v207_v1 = vld [vmem:[%s778_s2 + $0x10] sm:$0xff]  ;;  %s191_s28 = scalar_select %p190_p11, %s595_s15, 1  ;;  %v606_v2 = vmov 0   ;;  %v205_v3 = vld [vmem:[%s778_s2] sm:$0xff]  ;;  %v208_v4 = vld [vmem:[%s778_s2 + $0x18] sm:$0xff] }
  0x15   : > { %313 = vmatprep.mubr.f32.mxu0 %v605_v0  ;;  %325 = vmatprep.mubr.f32.mxu1 %v605_v0  ;;  %v206_v5 = vld [vmem:[%s778_s2 + $0x8] sm:$0xff]  ;;  %vm244_vm0 = vcmask 1043456   ;;  %v200_v8 = vld [vmem:[%s777_s1] sm:$0xff]  ;;  %vm231_vm1 = vcmask 31744   ;;  %v202_v9 = vld [vmem:[%s777_s1 + $0x10] sm:$0xff]  ;;  %vm339_vm2 = vcmask 523264  }
  0x16   : > { %525 = vset.pattern.permute.xlu1 %v606_v2  ;;  %524 = vset.pattern.permute.xlu0 %v606_v2  ;;  %s461_s4 = sshll.u32 %s191_s28, 3  ;;  %v201_v10 = vld [vmem:[%s777_s1 + $0x8] sm:$0xff]  ;;  %v203_v11 = vld [vmem:[%s777_s1 + $0x18] sm:$0xff]  ;;  %s731_s15 = scalar_lea.sflag [#allocation3], %s186_s30 }
  0x17   : > { %221 = vperm.xlu1 %525, %v207_v1   ;;  %211 = vperm.xlu0 %524, %v205_v3   ;;  %s197_s11 = scalar_lea.vmem %s776_s0, %s461_s4  ;;  %s447_s4 = sshll.u32 %s186_s30, 6 }
  0x18   : > { %v204_v6 = vld [vmem:[%s197_s11] sm:$0xff]  ;;  %s188_s5 = scalar_lea.vmem [#allocation2], %s447_s4 }
  0x19   : > { %v230_v7 = vcombine.high %v204_v6, %v204_v6  ;;  %s363_s7 = sshll.u32 %s188_s5, 4  ;;  %s725_s7 = int_to_ptr.vmem [resolvable:$true] %s363_s7 }
  0x1a   : > { %s527_s11 = scalar_lea.vmem %s725_s7, 1024  ;;  %p534_p1 = scmp.lt.s32.totalorder %s725_s7, %s532_s19 }
  0x1b   : > { %226 = vperm.xlu1 %525, %v208_v4   ;;  %216 = vperm.xlu0 %524, %v206_v5   ;;  %p528_p12 = scmp.ne.s32.totalorder %s725_s7, %s527_s11  ;;  %p535_p2 = scmp.lt.s32.totalorder %s533_s21, %s527_s11 }
  0x1c   : > { %450 = vmatprep.subr.msk.mxu0 %vm244_vm0, %v230_v7  ;;  %463 = vmatprep.subr.msk.mxu1 %vm244_vm0, %v230_v7 }
  0x1d   : > { %451 = vmatpush1.msk.msra.mxu0 %vm244_vm0, %v204_v6  ;;  %464 = vmatpush1.msk.msra.mxu1 %vm244_vm0, %v204_v6  ;;  %p529_p13 = pnand %p528_p12, %p670_p4  ;;  %p536_p3 = por %p535_p2, %p534_p1 }
  0x1e   : > { %452 = vmatmul.mubr.msk.f32.vlgmr.msra.gmra.mxu0 %vm231_vm1, %v200_v8  ;;  %454 = vmatmul.mubr.msk.f32.vlgmr.msra.gmra.mxu1 %vm231_vm1, %v202_v9 }
  0x1f   : > { %319 = vmatprep.mubr.f32.mxu0 %v605_v0  ;;  %331 = vmatprep.mubr.f32.mxu1 %v605_v0  ;;  %p530_p0 = pneg %p529_p13 }
  0x21   : > { %p537_p5 = pnand %p536_p3, %p530_p0 }
  0x22   : > { %453 = vmatmul.mubr.msk.f32.gmra.mxu0 %vm231_vm1, %v201_v10  ;;  %455 = vmatmul.mubr.msk.f32.gmra.mxu1 %vm231_vm1, %v203_v11 }
  0x92   : > { %v222_v12 = vpop.permute.xlu1 %221  ;;  %v212_v13 = vpop.permute.xlu0 %211 }
  0x96   : > { %v227_v20 = vpop.permute.xlu1 %226  ;;  %v217_v21 = vpop.permute.xlu0 %216 }
  0xde   : > { %v315_v14 = vpop.f32.mrf.mxu0  ;;  %v327_v15 = vpop.f32.mrf.mxu1 }
  0xdf   : > { %v316_v16 = vadd.f32 %v315_v14, %v212_v13  ;;  %v328_v17 = vadd.f32 %v327_v15, %v222_v12 }
  0xe0   : > { %v317_v18 = vpop.f32.mrf.mxu0  ;;  %v329_v19 = vpop.f32.mrf.mxu1 }
  0xe1   : > { %338 = vst [vmem:[%s188_s5] sm:$0xff] %v316_v16  ;;  %343 = vst [vmem:[%s188_s5 + $0x20] sm:$0xff] %v328_v17  ;;  %v318_v22 = vadd.f32 %v317_v18, %v212_v13  ;;  %v330_v23 = vadd.f32 %v329_v19, %v222_v12 }
  0xe2   : > { %v321_v24 = vpop.f32.mrf.mxu0  ;;  %v333_v25 = vpop.f32.mrf.mxu1 }
  0xe3   : > { %340 = vst.msk [vmem:[%s188_s5 + $0x8] sm:$0xff] %vm339_vm2, %v318_v22  ;;  %344 = vst.msk [vmem:[%s188_s5 + $0x28] sm:$0xff] %vm339_vm2, %v330_v23  ;;  %v322_v26 = vadd.f32 %v321_v24, %v217_v21  ;;  %v334_v27 = vadd.f32 %v333_v25, %v227_v20 }
  0xe4   : > { %v323_v28 = vpop.f32.mrf.mxu0  ;;  %v335_v29 = vpop.f32.mrf.mxu1 }
  0xe5   : > { %341 = vst [vmem:[%s188_s5 + $0x10] sm:$0xff] %v322_v26  ;;  %345 = vst [vmem:[%s188_s5 + $0x30] sm:$0xff] %v334_v27  ;;  %v324_v30 = vadd.f32 %v323_v28, %v217_v21  ;;  %v336_v31 = vadd.f32 %v335_v29, %v227_v20 }
  0xe7   : > { %342 = vst.msk [vmem:[%s188_s5 + $0x18] sm:$0xff] %vm339_vm2, %v324_v30  ;;  %346 = vst.msk [vmem:[%s188_s5 + $0x38] sm:$0xff] %vm339_vm2, %v336_v31 }
  0xe8   : > { %540 = shalt.err (!%p537_p5)
}
  0xe9   : > { %s541_s23 = scalar_lea.hbm %s723_s10, 1024  ;;  %s545_s28 = scalar_lea.hbm %s779_s3, 2048 }
  0xea   : > { %p542_p6 = scmp.ne.s32.totalorder %s723_s10, %s541_s23  ;;  %p546_p10 = scmp.lt.s32.totalorder %s723_s10, %s779_s3 }
  0xeb   : > { %p547_p11 = scmp.lt.s32.totalorder %s545_s28, %s541_s23 }
  0xec   : > { %p543_p7 = pnand %p542_p6, %p670_p4 }
  0xed   : > { %p548_p12 = por %p547_p11, %p546_p10 }
  0xee   : > { %p544_p9 = pneg %p543_p7 }
  0xf0   : > { %p549_p13 = pnand %p548_p12, %p544_p9 }
  0xf2   : > { %552 = shalt.err (!%p549_p13)
}
  0xf3   : > { %s608_s4 = smov 256   ;;  %s609_s5 = smov 16  }
  0xf4   : > { %465 = dma.vmem_to_hbm [thread:$0]  (%p670_p4), %s725_s7, 1024, %s723_s10, %s731_s15, %s608_s4, %s608_s4, %s609_s5  }
  0xf5 PF: > { %p471_p0 = scmp.ge.s32.totalorder %s603_s17, 2  ;;  %s378_s6 = sand.u32 1, %s583_s12  }
  0xf6   : > { %s379_s8 = scalar_lea.sflag [#allocation3], %s378_s6 }
  0xf7   : > { %p468_p1 = pnand %p471_p0, %p677_p8 }
  0xf9   : > { %p469_p2 = pneg %p468_p1 }
  0xfb   : > { %578 = dma.done.wait (%p469_p2), %s379_s8, 1024  }
  0xfc   : > { %580 = vsyncadd (%p469_p2), %s379_s8, 4294966272  ;;  %s16_s17 = sadd.s32 1, %s603_s17   ;;  %s782_s12 = smov %s587_s13 }
  0xfd   : > { %p13_p3 = scmp.ge.s32.totalorder %s16_s17, 4   ;;  %s783_s13 = smov %s591_s14 }
  0xfe   : > { %s784_s14 = smov %s683_s25  ;;  %s785_s15 = smov %s599_s16 }
  0xff   : > { %s786_s16 = smov %s788_s20  ;;  %15 = sbr.rel (!%p13_p3) target bundleno = 4 (0x4), region = 67 }
 0x104   :  { %384 = vsyncpa [#allocation3], 1 }
 0x105   :  { %386 = vsyncpa [#allocation3 + $0x1], 1 }

</bundles_post_ra>
